<compile_context>
chip_gen: v5e
topology: v5e:2x2
jax: 0.10.0
libtpu: 0.0.40
codegen_flags: <defaults>
</compile_context>

<pallas_src>
import math

import jax
import jax.numpy as jnp
from jax.experimental import pallas as pl
from jax.experimental.pallas import tpu as pltpu


# ----------------------------------------------------------------------------
# In-kernel helpers (pure jnp, traced inside the Pallas body).
# ----------------------------------------------------------------------------
def _gelu_tanh(x):
    # tanh-form GELU (EUP).  nn.GELU() default is exact-erf; the tanh form
    # differs by <~1e-3 elementwise.
    c = 0.7978845608028654  # sqrt(2/pi)
    return 0.5 * x * (1.0 + jnp.tanh(c * (x + 0.044715 * x * x * x)))


def _conv_same_2d(h, w2d, bias, K, dilation, T):
    """Dilated 'same' Conv1d on a single (C_in, T) slab as ONE matmul.

    h    : (C_in, T)
    w2d  : (C_out, K*C_in)   with w2d[co, k*C_in + ci] = w[co, ci, k]
    bias : (C_out, 1)
    """
    c_in = h.shape[0]
    total = dilation * (K - 1)
    left = total // 2
    right = total - left
    parts = []
    if left:
        parts.append(jnp.zeros((c_in, left), jnp.float32))
    parts.append(h)
    if right:
        parts.append(jnp.zeros((c_in, right), jnp.float32))
    hp = jnp.concatenate(parts, axis=1) if len(parts) > 1 else h  # (C_in, T+pad)
    # im2col slab, rows ordered k-major to match w2d.
    slab = jnp.concatenate(
        [hp[:, k * dilation:k * dilation + T] for k in range(K)], axis=0)
    return jnp.dot(w2d, slab, preferred_element_type=jnp.float32) + bias


# ----------------------------------------------------------------------------
# The fused kernel: one invocation, intermediates never leave VMEM/vregs.
# ----------------------------------------------------------------------------
def _make_fused_kernel(B, C0, T0, layer_meta, sm_meta):
    """layer_meta: tuple of (C_in, C_out, K, dilation, T_in, T_out)
       sm_meta  : (C_sm, K_sm, T_sm)"""
    nl = len(layer_meta)

    def kernel(x_ref, lin_w_ref, lin_b_ref, *refs):
        layer_refs = refs[:3 * nl]
        sm_w_ref = refs[3 * nl]
        sm_b_ref = refs[3 * nl + 1]
        o_ref = refs[3 * nl + 2]

        # Hoist every weight load out of the unrolled batch loop (JAX does not
        # CSE ref reads; re-reading inside the loop duplicates vector loads).
        lin_w = lin_w_ref[...]
        lin_b = lin_b_ref[...]
        layer_w = [(layer_refs[3 * li][...],
                    layer_refs[3 * li + 1][...],
                    layer_refs[3 * li + 2][...]) for li in range(nl)]
        sm_w = sm_w_ref[...]
        sm_b = sm_b_ref[...]
        c_sm, k_sm, t_sm = sm_meta

        # Latent linear for the whole batch in one MXU call (BN folded host-side).
        y = jnp.dot(x_ref[...], lin_w,
                    preferred_element_type=jnp.float32) + lin_b     # (B, C0*T0)

        for b in range(B):  # B is tiny; static unroll.
            # Unflatten row b into a (C0, T0) map using static lane slices +
            # a sublane concat (Mosaic-safe; avoids a lane->sublane reshape).
            h = jnp.concatenate(
                [y[b:b + 1, c * T0:(c + 1) * T0] for c in range(C0)], axis=0)

            # ResidualBlock(ConvSameTimesteps) + UpsampleTimesteps per layer.
            # (1x1 skip already folded into the center conv tap host-side.)
            for li, (_c_in, _c_out, K, d, t_in, _t_out) in enumerate(layer_meta):
                w2d, bias, up = layer_w[li]
                h = _conv_same_2d(h, w2d, bias, K, d, t_in)             # (C_out, T_in)
                h = jnp.dot(h, up, preferred_element_type=jnp.float32)  # (C_out, T_out)

            # Smoothing head: GELU -> Conv1d(k=7, 'same').  GELU(0)==0 so
            # padding after the GELU matches PyTorch's pad-inside-conv order.
            g = _gelu_tanh(h)
            o_ref[b] = _conv_same_2d(g, sm_w, sm_b, k_sm, 1, t_sm)

    return kernel


def skip_decoder_forward(params, x):
    B, _ = x.shape
    c0, t0 = params["shape0"]
    layers = params["layers"]
    layer_meta = tuple(l["meta"] for l in layers)
    c_sm, k_sm, t_sm = params["sm_meta"]

    inputs = [x, params["lin_w"], params["lin_b"]]
    for l in layers:
        inputs.extend([l["w2d"], l["b"], l["up"]])
    inputs.extend([params["sm_w2d"], params["sm_b"]])

    kernel = _make_fused_kernel(B, c0, t0, layer_meta, (c_sm, k_sm, t_sm))
    vmem = pl.BlockSpec(memory_space=pltpu.MemorySpace.VMEM)
    out = pl.pallas_call(
        kernel,
        out_shape=jax.ShapeDtypeStruct((B, c_sm, t_sm), jnp.float32),
        in_specs=[vmem] * len(inputs),
        out_specs=vmem,
    )(*inputs)
    return out


# ----------------------------------------------------------------------------
# Parameter setup: PyTorch-default-style uniform init + host-side folding of
# BatchNorm (into the Linear) and the 1x1 skip (into the center conv tap).
# ----------------------------------------------------------------------------
def _linear_upsample_matrix(t_in, t_out):
    # matches F.interpolate(mode='linear', align_corners=False)
    j = jnp.arange(t_out, dtype=jnp.float32)
    src = jnp.clip((j + 0.5) * (t_in / t_out) - 0.5, 0.0, t_in - 1)
    lo = jnp.floor(src).astype(jnp.int32)
    hi = jnp.minimum(lo + 1, t_in - 1)
    frac = src - lo.astype(jnp.float32)
    i = jnp.arange(t_in)[:, None]
    m = (i == lo[None, :]).astype(jnp.float32) * (1.0 - frac)[None, :] \
        + (i == hi[None, :]).astype(jnp.float32) * frac[None, :]
    return m.astype(jnp.float32)  # (t_in, t_out)


def init_skip_decoder(key, latent_dim, channels, timesteps, kernel_size=3):
    ts = timesteps[::-1]
    ch = channels[::-1]
    keys = iter(jax.random.split(key, 64))

    def u(k, shape, fan_in):
        bound = 1.0 / math.sqrt(fan_in)
        return jax.random.uniform(k, shape, jnp.float32, -bound, bound)

    c0, t0 = ch[0], ts[0]
    lin_w = u(next(keys), (latent_dim, c0 * t0), latent_dim)
    lin_b = u(next(keys), (1, c0 * t0), latent_dim)

    # BatchNorm1d(c0), eval mode with default running stats — fold into linear.
    gamma, beta = jnp.ones((c0,), jnp.float32), jnp.zeros((c0,), jnp.float32)
    rmean, rvar, eps = jnp.zeros((c0,)), jnp.ones((c0,)), 1e-5
    scale = gamma / jnp.sqrt(rvar + eps)
    shift = beta - rmean * scale
    scale_flat = jnp.repeat(scale, t0)[None, :].astype(jnp.float32)
    shift_flat = jnp.repeat(shift, t0)[None, :].astype(jnp.float32)

    params = {
        "shape0": (c0, t0),
        "lin_w": (lin_w * scale_flat).astype(jnp.float32),
        "lin_b": (lin_b * scale_flat + shift_flat).astype(jnp.float32),
    }

    layers = []
    for i in range(len(ts) - 1):
        cin, cout = ch[i], ch[i + 1]
        K, d = kernel_size, i + 1
        w = u(next(keys), (cout, cin, K), cin * K)
        b = u(next(keys), (cout, 1), cin * K)
        w_skip = u(next(keys), (cout, cin), cin)
        b_skip = u(next(keys), (cout, 1), cin)
        # Fold the 1x1 residual skip into the center tap ('same' + odd K aligns
        # the center tap with the un-shifted input).
        w = w.at[:, :, K // 2].add(w_skip)
        b = b + b_skip
        # (C_out, C_in, K) -> (C_out, K*C_in), k-major to match the im2col slab.
        w2d = jnp.transpose(w, (0, 2, 1)).reshape(cout, K * cin)
        layers.append({
            "w2d": w2d.astype(jnp.float32),
            "b": b.astype(jnp.float32),
            "up": _linear_upsample_matrix(ts[i], ts[i + 1]),
            "meta": (cin, cout, K, d, ts[i], ts[i + 1]),
        })
    params["layers"] = layers

    csm, ksm = ch[-1], 7
    sm_w = u(next(keys), (csm, csm, ksm), csm * ksm)
    sm_b = u(next(keys), (csm, 1), csm * ksm)
    params["sm_w2d"] = jnp.transpose(sm_w, (0, 2, 1)).reshape(csm, ksm * csm)
    params["sm_b"] = sm_b.astype(jnp.float32)
    params["sm_meta"] = (csm, ksm, ts[-1])
    return params


if __name__ == "__main__":
    key = jax.random.PRNGKey(0)
    latent_dim = 32
    channels = [4, 8, 16]      # encoder order -> decoder uses [16, 8, 4]
    timesteps = [32, 16, 8]    # encoder order -> decoder uses [8, 16, 32]
    B = 2

    pkey, xkey = jax.random.split(key)
    params = init_skip_decoder(pkey, latent_dim, channels, timesteps, kernel_size=3)
    x = jax.random.normal(xkey, (B, latent_dim), jnp.float32)

    out = skip_decoder_forward(params, x)
    out = jax.block_until_ready(out)

    assert out.shape == (B, channels[0], timesteps[0]), out.shape
    assert bool(jnp.all(jnp.isfinite(out)))
    print("KERNEL_OK")
</pallas_src>

<mosaic_0001>
module attributes {stable_mosaic.version = 11 : i64} {
  func.func @kernel(%arg0: memref<2x32xf32, #tpu.memory_space<vmem>>, %arg1: memref<32x128xf32, #tpu.memory_space<vmem>>, %arg2: memref<1x128xf32, #tpu.memory_space<vmem>>, %arg3: memref<8x48xf32, #tpu.memory_space<vmem>>, %arg4: memref<8x1xf32, #tpu.memory_space<vmem>>, %arg5: memref<8x16xf32, #tpu.memory_space<vmem>>, %arg6: memref<4x24xf32, #tpu.memory_space<vmem>>, %arg7: memref<4x1xf32, #tpu.memory_space<vmem>>, %arg8: memref<16x32xf32, #tpu.memory_space<vmem>>, %arg9: memref<4x28xf32, #tpu.memory_space<vmem>>, %arg10: memref<4x1xf32, #tpu.memory_space<vmem>>, %arg11: memref<2x4x32xf32, #tpu.memory_space<vmem>>) attributes {dimension_semantics = [], scalar_prefetch = 0 : i64, scratch_operands = 0 : i64, tpu.core_type = #tpu.core_type<tc>} {
    %c0 = arith.constant 0 : index
    %c0_0 = arith.constant 0 : index
    %0 = vector.load %arg1[%c0, %c0_0] : memref<32x128xf32, #tpu.memory_space<vmem>>, vector<32x128xf32>
    %c0_1 = arith.constant 0 : index
    %c0_2 = arith.constant 0 : index
    %1 = vector.load %arg2[%c0_1, %c0_2] : memref<1x128xf32, #tpu.memory_space<vmem>>, vector<1x128xf32>
    %c0_3 = arith.constant 0 : index
    %c0_4 = arith.constant 0 : index
    %2 = vector.load %arg3[%c0_3, %c0_4] : memref<8x48xf32, #tpu.memory_space<vmem>>, vector<8x48xf32>
    %c0_5 = arith.constant 0 : index
    %c0_6 = arith.constant 0 : index
    %3 = vector.load %arg4[%c0_5, %c0_6] : memref<8x1xf32, #tpu.memory_space<vmem>>, vector<8x1xf32>
    %c0_7 = arith.constant 0 : index
    %c0_8 = arith.constant 0 : index
    %4 = vector.load %arg5[%c0_7, %c0_8] : memref<8x16xf32, #tpu.memory_space<vmem>>, vector<8x16xf32>
    %c0_9 = arith.constant 0 : index
    %c0_10 = arith.constant 0 : index
    %5 = vector.load %arg6[%c0_9, %c0_10] : memref<4x24xf32, #tpu.memory_space<vmem>>, vector<4x24xf32>
    %c0_11 = arith.constant 0 : index
    %c0_12 = arith.constant 0 : index
    %6 = vector.load %arg7[%c0_11, %c0_12] : memref<4x1xf32, #tpu.memory_space<vmem>>, vector<4x1xf32>
    %c0_13 = arith.constant 0 : index
    %c0_14 = arith.constant 0 : index
    %7 = vector.load %arg8[%c0_13, %c0_14] : memref<16x32xf32, #tpu.memory_space<vmem>>, vector<16x32xf32>
    %c0_15 = arith.constant 0 : index
    %c0_16 = arith.constant 0 : index
    %8 = vector.load %arg9[%c0_15, %c0_16] : memref<4x28xf32, #tpu.memory_space<vmem>>, vector<4x28xf32>
    %c0_17 = arith.constant 0 : index
    %c0_18 = arith.constant 0 : index
    %9 = vector.load %arg10[%c0_17, %c0_18] : memref<4x1xf32, #tpu.memory_space<vmem>>, vector<4x1xf32>
    %c0_19 = arith.constant 0 : index
    %c0_20 = arith.constant 0 : index
    %10 = vector.load %arg0[%c0_19, %c0_20] : memref<2x32xf32, #tpu.memory_space<vmem>>, vector<2x32xf32>
    %cst = arith.constant dense<0.000000e+00> : vector<2x128xf32>
    %11 = tpu.matmul %10, %0, %cst {dimension_numbers = #tpu.dot_dimension_numbers<[1], [0], [0], [1], [0, 0, 1, 1], [], []>} : vector<2x32xf32>, vector<32x128xf32>, vector<2x128xf32> -> vector<2x128xf32>
    %12 = vector.broadcast %1 : vector<1x128xf32> to vector<2x128xf32>
    %13 = arith.addf %11, %12 : vector<2x128xf32>
    %14 = vector.extract_strided_slice %13 {offsets = [0, 0], sizes = [1, 8], strides = [1, 1]} : vector<2x128xf32> to vector<1x8xf32>
    %15 = vector.extract_strided_slice %13 {offsets = [0, 8], sizes = [1, 8], strides = [1, 1]} : vector<2x128xf32> to vector<1x8xf32>
    %16 = vector.extract_strided_slice %13 {offsets = [0, 16], sizes = [1, 8], strides = [1, 1]} : vector<2x128xf32> to vector<1x8xf32>
    %17 = vector.extract_strided_slice %13 {offsets = [0, 24], sizes = [1, 8], strides = [1, 1]} : vector<2x128xf32> to vector<1x8xf32>
    %18 = vector.extract_strided_slice %13 {offsets = [0, 32], sizes = [1, 8], strides = [1, 1]} : vector<2x128xf32> to vector<1x8xf32>
    %19 = vector.extract_strided_slice %13 {offsets = [0, 40], sizes = [1, 8], strides = [1, 1]} : vector<2x128xf32> to vector<1x8xf32>
    %20 = vector.extract_strided_slice %13 {offsets = [0, 48], sizes = [1, 8], strides = [1, 1]} : vector<2x128xf32> to vector<1x8xf32>
    %21 = vector.extract_strided_slice %13 {offsets = [0, 56], sizes = [1, 8], strides = [1, 1]} : vector<2x128xf32> to vector<1x8xf32>
    %22 = vector.extract_strided_slice %13 {offsets = [0, 64], sizes = [1, 8], strides = [1, 1]} : vector<2x128xf32> to vector<1x8xf32>
    %23 = vector.extract_strided_slice %13 {offsets = [0, 72], sizes = [1, 8], strides = [1, 1]} : vector<2x128xf32> to vector<1x8xf32>
    %24 = vector.extract_strided_slice %13 {offsets = [0, 80], sizes = [1, 8], strides = [1, 1]} : vector<2x128xf32> to vector<1x8xf32>
    %25 = vector.extract_strided_slice %13 {offsets = [0, 88], sizes = [1, 8], strides = [1, 1]} : vector<2x128xf32> to vector<1x8xf32>
    %26 = vector.extract_strided_slice %13 {offsets = [0, 96], sizes = [1, 8], strides = [1, 1]} : vector<2x128xf32> to vector<1x8xf32>
    %27 = vector.extract_strided_slice %13 {offsets = [0, 104], sizes = [1, 8], strides = [1, 1]} : vector<2x128xf32> to vector<1x8xf32>
    %28 = vector.extract_strided_slice %13 {offsets = [0, 112], sizes = [1, 8], strides = [1, 1]} : vector<2x128xf32> to vector<1x8xf32>
    %29 = vector.extract_strided_slice %13 {offsets = [0, 120], sizes = [1, 8], strides = [1, 1]} : vector<2x128xf32> to vector<1x8xf32>
    %30 = tpu.concatenate %14, %15, %16, %17, %18, %19, %20, %21, %22, %23, %24, %25, %26, %27, %28, %29 in 0 : vector<1x8xf32>, vector<1x8xf32>, vector<1x8xf32>, vector<1x8xf32>, vector<1x8xf32>, vector<1x8xf32>, vector<1x8xf32>, vector<1x8xf32>, vector<1x8xf32>, vector<1x8xf32>, vector<1x8xf32>, vector<1x8xf32>, vector<1x8xf32>, vector<1x8xf32>, vector<1x8xf32>, vector<1x8xf32> -> vector<16x8xf32>
    %cst_21 = arith.constant 0.000000e+00 : f32
    %31 = vector.broadcast %cst_21 : f32 to vector<16x1xf32>
    %cst_22 = arith.constant 0.000000e+00 : f32
    %32 = vector.broadcast %cst_22 : f32 to vector<16x1xf32>
    %33 = tpu.concatenate %31, %30, %32 in 1 : vector<16x1xf32>, vector<16x8xf32>, vector<16x1xf32> -> vector<16x10xf32>
    %34 = vector.extract_strided_slice %33 {offsets = [0, 0], sizes = [16, 8], strides = [1, 1]} : vector<16x10xf32> to vector<16x8xf32>
    %35 = vector.extract_strided_slice %33 {offsets = [0, 1], sizes = [16, 8], strides = [1, 1]} : vector<16x10xf32> to vector<16x8xf32>
    %36 = vector.extract_strided_slice %33 {offsets = [0, 2], sizes = [16, 8], strides = [1, 1]} : vector<16x10xf32> to vector<16x8xf32>
    %37 = tpu.concatenate %34, %35, %36 in 0 : vector<16x8xf32>, vector<16x8xf32>, vector<16x8xf32> -> vector<48x8xf32>
    %cst_23 = arith.constant dense<0.000000e+00> : vector<8x8xf32>
    %38 = tpu.matmul %2, %37, %cst_23 {dimension_numbers = #tpu.dot_dimension_numbers<[1], [0], [0], [1], [0, 0, 1, 1], [], []>} : vector<8x48xf32>, vector<48x8xf32>, vector<8x8xf32> -> vector<8x8xf32>
    %39 = vector.broadcast %3 : vector<8x1xf32> to vector<8x8xf32>
    %40 = arith.addf %38, %39 : vector<8x8xf32>
    %cst_24 = arith.constant dense<0.000000e+00> : vector<8x16xf32>
    %41 = tpu.matmul %40, %4, %cst_24 {dimension_numbers = #tpu.dot_dimension_numbers<[1], [0], [0], [1], [0, 0, 1, 1], [], []>} : vector<8x8xf32>, vector<8x16xf32>, vector<8x16xf32> -> vector<8x16xf32>
    %cst_25 = arith.constant 0.000000e+00 : f32
    %42 = vector.broadcast %cst_25 : f32 to vector<8x2xf32>
    %cst_26 = arith.constant 0.000000e+00 : f32
    %43 = vector.broadcast %cst_26 : f32 to vector<8x2xf32>
    %44 = tpu.concatenate %42, %41, %43 in 1 : vector<8x2xf32>, vector<8x16xf32>, vector<8x2xf32> -> vector<8x20xf32>
    %45 = vector.extract_strided_slice %44 {offsets = [0, 0], sizes = [8, 16], strides = [1, 1]} : vector<8x20xf32> to vector<8x16xf32>
    %46 = vector.extract_strided_slice %44 {offsets = [0, 2], sizes = [8, 16], strides = [1, 1]} : vector<8x20xf32> to vector<8x16xf32>
    %47 = vector.extract_strided_slice %44 {offsets = [0, 4], sizes = [8, 16], strides = [1, 1]} : vector<8x20xf32> to vector<8x16xf32>
    %48 = tpu.concatenate %45, %46, %47 in 0 : vector<8x16xf32>, vector<8x16xf32>, vector<8x16xf32> -> vector<24x16xf32>
    %cst_27 = arith.constant dense<0.000000e+00> : vector<4x16xf32>
    %49 = tpu.matmul %5, %48, %cst_27 {dimension_numbers = #tpu.dot_dimension_numbers<[1], [0], [0], [1], [0, 0, 1, 1], [], []>} : vector<4x24xf32>, vector<24x16xf32>, vector<4x16xf32> -> vector<4x16xf32>
    %50 = vector.broadcast %6 : vector<4x1xf32> to vector<4x16xf32>
    %51 = arith.addf %49, %50 : vector<4x16xf32>
    %cst_28 = arith.constant dense<0.000000e+00> : vector<4x32xf32>
    %52 = tpu.matmul %51, %7, %cst_28 {dimension_numbers = #tpu.dot_dimension_numbers<[1], [0], [0], [1], [0, 0, 1, 1], [], []>} : vector<4x16xf32>, vector<16x32xf32>, vector<4x32xf32> -> vector<4x32xf32>
    %cst_29 = arith.constant 5.000000e-01 : f32
    %53 = vector.broadcast %cst_29 : f32 to vector<4x32xf32>
    %54 = arith.mulf %53, %52 : vector<4x32xf32>
    %cst_30 = arith.constant 4.471500e-02 : f32
    %55 = vector.broadcast %cst_30 : f32 to vector<4x32xf32>
    %56 = arith.mulf %55, %52 : vector<4x32xf32>
    %57 = arith.mulf %56, %52 : vector<4x32xf32>
    %58 = arith.mulf %57, %52 : vector<4x32xf32>
    %59 = arith.addf %52, %58 : vector<4x32xf32>
    %cst_31 = arith.constant 0.797884583 : f32
    %60 = vector.broadcast %cst_31 : f32 to vector<4x32xf32>
    %61 = arith.mulf %60, %59 : vector<4x32xf32>
    %62 = math.tanh %61 : vector<4x32xf32>
    %cst_32 = arith.constant 1.000000e+00 : f32
    %63 = vector.broadcast %cst_32 : f32 to vector<4x32xf32>
    %64 = arith.addf %63, %62 : vector<4x32xf32>
    %65 = arith.mulf %54, %64 : vector<4x32xf32>
    %cst_33 = arith.constant 0.000000e+00 : f32
    %66 = vector.broadcast %cst_33 : f32 to vector<4x3xf32>
    %cst_34 = arith.constant 0.000000e+00 : f32
    %67 = vector.broadcast %cst_34 : f32 to vector<4x3xf32>
    %68 = tpu.concatenate %66, %65, %67 in 1 : vector<4x3xf32>, vector<4x32xf32>, vector<4x3xf32> -> vector<4x38xf32>
    %69 = vector.extract_strided_slice %68 {offsets = [0, 0], sizes = [4, 32], strides = [1, 1]} : vector<4x38xf32> to vector<4x32xf32>
    %70 = vector.extract_strided_slice %68 {offsets = [0, 1], sizes = [4, 32], strides = [1, 1]} : vector<4x38xf32> to vector<4x32xf32>
    %71 = vector.extract_strided_slice %68 {offsets = [0, 2], sizes = [4, 32], strides = [1, 1]} : vector<4x38xf32> to vector<4x32xf32>
    %72 = vector.extract_strided_slice %68 {offsets = [0, 3], sizes = [4, 32], strides = [1, 1]} : vector<4x38xf32> to vector<4x32xf32>
    %73 = vector.extract_strided_slice %68 {offsets = [0, 4], sizes = [4, 32], strides = [1, 1]} : vector<4x38xf32> to vector<4x32xf32>
    %74 = vector.extract_strided_slice %68 {offsets = [0, 5], sizes = [4, 32], strides = [1, 1]} : vector<4x38xf32> to vector<4x32xf32>
    %75 = vector.extract_strided_slice %68 {offsets = [0, 6], sizes = [4, 32], strides = [1, 1]} : vector<4x38xf32> to vector<4x32xf32>
    %76 = tpu.concatenate %69, %70, %71, %72, %73, %74, %75 in 0 : vector<4x32xf32>, vector<4x32xf32>, vector<4x32xf32>, vector<4x32xf32>, vector<4x32xf32>, vector<4x32xf32>, vector<4x32xf32> -> vector<28x32xf32>
    %cst_35 = arith.constant dense<0.000000e+00> : vector<4x32xf32>
    %77 = tpu.matmul %8, %76, %cst_35 {dimension_numbers = #tpu.dot_dimension_numbers<[1], [0], [0], [1], [0, 0, 1, 1], [], []>} : vector<4x28xf32>, vector<28x32xf32>, vector<4x32xf32> -> vector<4x32xf32>
    %78 = vector.broadcast %9 : vector<4x1xf32> to vector<4x32xf32>
    %79 = arith.addf %77, %78 : vector<4x32xf32>
    %c0_36 = arith.constant 0 : index
    %c0_37 = arith.constant 0 : index
    %c0_38 = arith.constant 0 : index
    %80 = vector.load %arg11[%c0_36, %c0_37, %c0_38] : memref<2x4x32xf32, #tpu.memory_space<vmem>>, vector<1x4x32xf32>
    %81 = vector.shape_cast %80 : vector<1x4x32xf32> to vector<4x32xf32>
    %82 = vector.shape_cast %79 : vector<4x32xf32> to vector<1x4x32xf32>
    tpu.vector_store %arg11[%c0_36, %c0_37, %c0_38], %82 {strides = array<i32>} : memref<2x4x32xf32, #tpu.memory_space<vmem>>, vector<1x4x32xf32>,
    %83 = vector.extract_strided_slice %13 {offsets = [1, 0], sizes = [1, 8], strides = [1, 1]} : vector<2x128xf32> to vector<1x8xf32>
    %84 = vector.extract_strided_slice %13 {offsets = [1, 8], sizes = [1, 8], strides = [1, 1]} : vector<2x128xf32> to vector<1x8xf32>
    %85 = vector.extract_strided_slice %13 {offsets = [1, 16], sizes = [1, 8], strides = [1, 1]} : vector<2x128xf32> to vector<1x8xf32>
    %86 = vector.extract_strided_slice %13 {offsets = [1, 24], sizes = [1, 8], strides = [1, 1]} : vector<2x128xf32> to vector<1x8xf32>
    %87 = vector.extract_strided_slice %13 {offsets = [1, 32], sizes = [1, 8], strides = [1, 1]} : vector<2x128xf32> to vector<1x8xf32>
    %88 = vector.extract_strided_slice %13 {offsets = [1, 40], sizes = [1, 8], strides = [1, 1]} : vector<2x128xf32> to vector<1x8xf32>
    %89 = vector.extract_strided_slice %13 {offsets = [1, 48], sizes = [1, 8], strides = [1, 1]} : vector<2x128xf32> to vector<1x8xf32>
    %90 = vector.extract_strided_slice %13 {offsets = [1, 56], sizes = [1, 8], strides = [1, 1]} : vector<2x128xf32> to vector<1x8xf32>
    %91 = vector.extract_strided_slice %13 {offsets = [1, 64], sizes = [1, 8], strides = [1, 1]} : vector<2x128xf32> to vector<1x8xf32>
    %92 = vector.extract_strided_slice %13 {offsets = [1, 72], sizes = [1, 8], strides = [1, 1]} : vector<2x128xf32> to vector<1x8xf32>
    %93 = vector.extract_strided_slice %13 {offsets = [1, 80], sizes = [1, 8], strides = [1, 1]} : vector<2x128xf32> to vector<1x8xf32>
    %94 = vector.extract_strided_slice %13 {offsets = [1, 88], sizes = [1, 8], strides = [1, 1]} : vector<2x128xf32> to vector<1x8xf32>
    %95 = vector.extract_strided_slice %13 {offsets = [1, 96], sizes = [1, 8], strides = [1, 1]} : vector<2x128xf32> to vector<1x8xf32>
    %96 = vector.extract_strided_slice %13 {offsets = [1, 104], sizes = [1, 8], strides = [1, 1]} : vector<2x128xf32> to vector<1x8xf32>
    %97 = vector.extract_strided_slice %13 {offsets = [1, 112], sizes = [1, 8], strides = [1, 1]} : vector<2x128xf32> to vector<1x8xf32>
    %98 = vector.extract_strided_slice %13 {offsets = [1, 120], sizes = [1, 8], strides = [1, 1]} : vector<2x128xf32> to vector<1x8xf32>
    %99 = tpu.concatenate %83, %84, %85, %86, %87, %88, %89, %90, %91, %92, %93, %94, %95, %96, %97, %98 in 0 : vector<1x8xf32>, vector<1x8xf32>, vector<1x8xf32>, vector<1x8xf32>, vector<1x8xf32>, vector<1x8xf32>, vector<1x8xf32>, vector<1x8xf32>, vector<1x8xf32>, vector<1x8xf32>, vector<1x8xf32>, vector<1x8xf32>, vector<1x8xf32>, vector<1x8xf32>, vector<1x8xf32>, vector<1x8xf32> -> vector<16x8xf32>
    %cst_39 = arith.constant 0.000000e+00 : f32
    %100 = vector.broadcast %cst_39 : f32 to vector<16x1xf32>
    %cst_40 = arith.constant 0.000000e+00 : f32
    %101 = vector.broadcast %cst_40 : f32 to vector<16x1xf32>
    %102 = tpu.concatenate %100, %99, %101 in 1 : vector<16x1xf32>, vector<16x8xf32>, vector<16x1xf32> -> vector<16x10xf32>
    %103 = vector.extract_strided_slice %102 {offsets = [0, 0], sizes = [16, 8], strides = [1, 1]} : vector<16x10xf32> to vector<16x8xf32>
    %104 = vector.extract_strided_slice %102 {offsets = [0, 1], sizes = [16, 8], strides = [1, 1]} : vector<16x10xf32> to vector<16x8xf32>
    %105 = vector.extract_strided_slice %102 {offsets = [0, 2], sizes = [16, 8], strides = [1, 1]} : vector<16x10xf32> to vector<16x8xf32>
    %106 = tpu.concatenate %103, %104, %105 in 0 : vector<16x8xf32>, vector<16x8xf32>, vector<16x8xf32> -> vector<48x8xf32>
    %cst_41 = arith.constant dense<0.000000e+00> : vector<8x8xf32>
    %107 = tpu.matmul %2, %106, %cst_41 {dimension_numbers = #tpu.dot_dimension_numbers<[1], [0], [0], [1], [0, 0, 1, 1], [], []>} : vector<8x48xf32>, vector<48x8xf32>, vector<8x8xf32> -> vector<8x8xf32>
    %108 = vector.broadcast %3 : vector<8x1xf32> to vector<8x8xf32>
    %109 = arith.addf %107, %108 : vector<8x8xf32>
    %cst_42 = arith.constant dense<0.000000e+00> : vector<8x16xf32>
    %110 = tpu.matmul %109, %4, %cst_42 {dimension_numbers = #tpu.dot_dimension_numbers<[1], [0], [0], [1], [0, 0, 1, 1], [], []>} : vector<8x8xf32>, vector<8x16xf32>, vector<8x16xf32> -> vector<8x16xf32>
    %cst_43 = arith.constant 0.000000e+00 : f32
    %111 = vector.broadcast %cst_43 : f32 to vector<8x2xf32>
    %cst_44 = arith.constant 0.000000e+00 : f32
    %112 = vector.broadcast %cst_44 : f32 to vector<8x2xf32>
    %113 = tpu.concatenate %111, %110, %112 in 1 : vector<8x2xf32>, vector<8x16xf32>, vector<8x2xf32> -> vector<8x20xf32>
    %114 = vector.extract_strided_slice %113 {offsets = [0, 0], sizes = [8, 16], strides = [1, 1]} : vector<8x20xf32> to vector<8x16xf32>
    %115 = vector.extract_strided_slice %113 {offsets = [0, 2], sizes = [8, 16], strides = [1, 1]} : vector<8x20xf32> to vector<8x16xf32>
    %116 = vector.extract_strided_slice %113 {offsets = [0, 4], sizes = [8, 16], strides = [1, 1]} : vector<8x20xf32> to vector<8x16xf32>
    %117 = tpu.concatenate %114, %115, %116 in 0 : vector<8x16xf32>, vector<8x16xf32>, vector<8x16xf32> -> vector<24x16xf32>
    %cst_45 = arith.constant dense<0.000000e+00> : vector<4x16xf32>
    %118 = tpu.matmul %5, %117, %cst_45 {dimension_numbers = #tpu.dot_dimension_numbers<[1], [0], [0], [1], [0, 0, 1, 1], [], []>} : vector<4x24xf32>, vector<24x16xf32>, vector<4x16xf32> -> vector<4x16xf32>
    %119 = vector.broadcast %6 : vector<4x1xf32> to vector<4x16xf32>
    %120 = arith.addf %118, %119 : vector<4x16xf32>
    %cst_46 = arith.constant dense<0.000000e+00> : vector<4x32xf32>
    %121 = tpu.matmul %120, %7, %cst_46 {dimension_numbers = #tpu.dot_dimension_numbers<[1], [0], [0], [1], [0, 0, 1, 1], [], []>} : vector<4x16xf32>, vector<16x32xf32>, vector<4x32xf32> -> vector<4x32xf32>
    %cst_47 = arith.constant 5.000000e-01 : f32
    %122 = vector.broadcast %cst_47 : f32 to vector<4x32xf32>
    %123 = arith.mulf %122, %121 : vector<4x32xf32>
    %cst_48 = arith.constant 4.471500e-02 : f32
    %124 = vector.broadcast %cst_48 : f32 to vector<4x32xf32>
    %125 = arith.mulf %124, %121 : vector<4x32xf32>
    %126 = arith.mulf %125, %121 : vector<4x32xf32>
    %127 = arith.mulf %126, %121 : vector<4x32xf32>
    %128 = arith.addf %121, %127 : vector<4x32xf32>
    %cst_49 = arith.constant 0.797884583 : f32
    %129 = vector.broadcast %cst_49 : f32 to vector<4x32xf32>
    %130 = arith.mulf %129, %128 : vector<4x32xf32>
    %131 = math.tanh %130 : vector<4x32xf32>
    %cst_50 = arith.constant 1.000000e+00 : f32
    %132 = vector.broadcast %cst_50 : f32 to vector<4x32xf32>
    %133 = arith.addf %132, %131 : vector<4x32xf32>
    %134 = arith.mulf %123, %133 : vector<4x32xf32>
    %cst_51 = arith.constant 0.000000e+00 : f32
    %135 = vector.broadcast %cst_51 : f32 to vector<4x3xf32>
    %cst_52 = arith.constant 0.000000e+00 : f32
    %136 = vector.broadcast %cst_52 : f32 to vector<4x3xf32>
    %137 = tpu.concatenate %135, %134, %136 in 1 : vector<4x3xf32>, vector<4x32xf32>, vector<4x3xf32> -> vector<4x38xf32>
    %138 = vector.extract_strided_slice %137 {offsets = [0, 0], sizes = [4, 32], strides = [1, 1]} : vector<4x38xf32> to vector<4x32xf32>
    %139 = vector.extract_strided_slice %137 {offsets = [0, 1], sizes = [4, 32], strides = [1, 1]} : vector<4x38xf32> to vector<4x32xf32>
    %140 = vector.extract_strided_slice %137 {offsets = [0, 2], sizes = [4, 32], strides = [1, 1]} : vector<4x38xf32> to vector<4x32xf32>
    %141 = vector.extract_strided_slice %137 {offsets = [0, 3], sizes = [4, 32], strides = [1, 1]} : vector<4x38xf32> to vector<4x32xf32>
    %142 = vector.extract_strided_slice %137 {offsets = [0, 4], sizes = [4, 32], strides = [1, 1]} : vector<4x38xf32> to vector<4x32xf32>
    %143 = vector.extract_strided_slice %137 {offsets = [0, 5], sizes = [4, 32], strides = [1, 1]} : vector<4x38xf32> to vector<4x32xf32>
    %144 = vector.extract_strided_slice %137 {offsets = [0, 6], sizes = [4, 32], strides = [1, 1]} : vector<4x38xf32> to vector<4x32xf32>
    %145 = tpu.concatenate %138, %139, %140, %141, %142, %143, %144 in 0 : vector<4x32xf32>, vector<4x32xf32>, vector<4x32xf32>, vector<4x32xf32>, vector<4x32xf32>, vector<4x32xf32>, vector<4x32xf32> -> vector<28x32xf32>
    %cst_53 = arith.constant dense<0.000000e+00> : vector<4x32xf32>
    %146 = tpu.matmul %8, %145, %cst_53 {dimension_numbers = #tpu.dot_dimension_numbers<[1], [0], [0], [1], [0, 0, 1, 1], [], []>} : vector<4x28xf32>, vector<28x32xf32>, vector<4x32xf32> -> vector<4x32xf32>
    %147 = vector.broadcast %9 : vector<4x1xf32> to vector<4x32xf32>
    %148 = arith.addf %146, %147 : vector<4x32xf32>
    %c1 = arith.constant 1 : index
    %c0_54 = arith.constant 0 : index
    %c0_55 = arith.constant 0 : index
    %149 = vector.load %arg11[%c1, %c0_54, %c0_55] : memref<2x4x32xf32, #tpu.memory_space<vmem>>, vector<1x4x32xf32>
    %150 = vector.shape_cast %149 : vector<1x4x32xf32> to vector<4x32xf32>
    %151 = vector.shape_cast %148 : vector<4x32xf32> to vector<1x4x32xf32>
    tpu.vector_store %arg11[%c1, %c0_54, %c0_55], %151 {strides = array<i32>} : memref<2x4x32xf32, #tpu.memory_space<vmem>>, vector<1x4x32xf32>,
    return
  }
}

</mosaic_0001>

<bundles_post_ra>
// kernel: tpu_custom_call.1
= control target key start
LH: loop header
LB: loop body
LE: loop exit
PB: predicated region body
PF: predicated region fallthrough
CT: control target
= control target key end

     0   :  { %16 = vsyncpa [#allocation3], 0  ;;  %s1241_s0 = inlined_call_operand.hbm [shape: f32[2,32], index: 0, kind: input, shape index: {}]   ;;  %s1242_s1 = inlined_call_operand.hbm [shape: f32[32,128], index: 1, kind: input, shape index: {}]   ;;  %s1243_s2 = inlined_call_operand.vmem [shape: f32[1,128], index: 2, kind: input, shape index: {}]   ;;  %s1244_s3 = inlined_call_operand.vmem [shape: f32[8,48], index: 3, kind: input, shape index: {}]   ;;  %s1245_s4 = inlined_call_operand.vmem [shape: f32[8,1], index: 4, kind: input, shape index: {}]   ;;  %s1246_s5 = inlined_call_operand.hbm [shape: f32[8,16], index: 5, kind: input, shape index: {}]   ;;  %s1247_s6 = inlined_call_operand.vmem [shape: f32[4,24], index: 6, kind: input, shape index: {}]   ;;  %s1248_s7 = inlined_call_operand.vmem [shape: f32[4,1], index: 7, kind: input, shape index: {}]   ;;  %s1249_s8 = inlined_call_operand.hbm [shape: f32[16,32], index: 8, kind: input, shape index: {}]   ;;  %s1250_s9 = inlined_call_operand.vmem [shape: f32[4,28], index: 9, kind: input, shape index: {}]   ;;  %s1251_s10 = inlined_call_operand.vmem [shape: f32[4,1], index: 10, kind: input, shape index: {}]   ;;  %s1252_s11 = inlined_call_operand.hbm [shape: f32[2,4,32], index: 11, kind: output, shape index: {}]  }
   0x1   :  { %17 = vsyncpa [#allocation6], 0 }
   0x2   :  { %18 = vsyncpa [#allocation9], 0  ;;  %s35_s19 = sshll.u32 %s1242_s1, 4  ;;  %s36_s19 = int_to_ptr.hbm [resolvable:$true] %s35_s19 }
   0x3   :  { %19 = vsyncpa [#allocation4], 0  ;;  %s908_s20 = smov [#allocation5]   ;;  %s25_s24 = sshll.u32 %s1241_s0, 4  ;;  %s26_s24 = int_to_ptr.hbm [resolvable:$true] %s25_s24 }
   0x4   :  { %s37_s21 = sshll.u32 %s908_s20, 4  ;;  %s909_s25 = smov 128   ;;  %s38_s21 = int_to_ptr.vmem [resolvable:$true] %s37_s21 }
   0x5   :  { %s910_s26 = smov 8   ;;  %s911_s27 = smov [#allocation2]  }
   0x6   :  { %43 = dma.hbm_to_vmem [thread:$0]  %s36_s19, 512, %s38_s21, [#allocation6], %s909_s25, %s909_s25, %s910_s26  }
   0x7   :  { %s27_s28 = sshll.u32 %s911_s27, 4  ;;  %s55_s1 = sshll.u32 %s1246_s5, 4  ;;  %s28_s28 = int_to_ptr.vmem [resolvable:$true] %s27_s28  ;;  %s56_s1 = int_to_ptr.hbm [resolvable:$true] %s55_s1 }
   0x8   :  { %30 = dma.hbm_to_vmem [thread:$0]  %s26_s24, 32, %s28_s28, [#allocation3]  }
   0x9   :  { %s69_s14 = sshll.u32 %s1249_s8, 4  ;;  %s912_s15 = smov [#allocation7]   ;;  %s70_s14 = int_to_ptr.hbm [resolvable:$true] %s69_s14 }
   0xa   :  { %s57_s0 = sshll.u32 %s912_s15, 4  ;;  %s913_s16 = smov [#allocation8]   ;;  %s58_s0 = int_to_ptr.vmem [resolvable:$true] %s57_s0 }
   0xb   :  { %60 = dma.hbm_to_vmem [thread:$0]  %s56_s1, 128, %s58_s0, [#allocation6]  }
   0xc   :  { %s71_s17 = sshll.u32 %s913_s16, 4  ;;  %s72_s17 = int_to_ptr.vmem [resolvable:$true] %s71_s17 }
   0xd   :  { %77 = dma.hbm_to_vmem [thread:$0]  %s70_s14, 256, %s72_s17, [#allocation9], %s909_s25, %s909_s25, %s910_s26  }
   0xe   :  { %900 = dma.done.wait [#allocation3], 32  }
   0xf   :  { %901 = vsyncadd [#allocation3], 4294967264 }
  0x10   :  { %902 = dma.done.wait [#allocation6], 640  }
  0x11   :  { %903 = vsyncadd [#allocation6], 4294966656 }
  0x12   :  { %904 = dma.done.wait [#allocation9], 256  }
  0x13   :  { %905 = vsyncadd [#allocation9], 4294967040  ;;  %v101_v0 = vld [vmem:[#allocation5 + $0x18] sm:$0xff]  ;;  %v100_v1 = vld [vmem:[#allocation5 + $0x10] sm:$0xff]  ;;  %vm116_vm0 = vcmask 261120   ;;  %s914_s18 = smov 64  }
  0x14   :  { %132 = vmatpush.msra.mxu0 %v101_v0  ;;  %v99_v2 = vld [vmem:[#allocation5 + $0x8] sm:$0xff]  ;;  %v98_v3 = vld [vmem:[#allocation5] sm:$0xff]  ;;  %v112_v4 = vld [vmem:[#allocation2] sm:$0x3]  ;;  %s915_s19 = smov 40   ;;  %s916_s20 = smov 48  }
  0x15   :  { %v775_v5 = vld [vmem:[%s1243_s2] ss:$0 sm:$0xff]  ;;  %s917_s2 = smov 56   ;;  %s918_s21 = smov 112   ;;  %v928_v19 = vmov 0   ;;  %vm193_vm1 = vcmask 1040384  }
  0x16   :  { %133 = vmatpush.msra.mxu0 %v100_v1  ;;  %s919_s22 = smov 120   ;;  %s920_s23 = smov 32   ;;  %763 = vset.pattern.permute.xlu1 %v928_v19  ;;  %vm195_vm2 = vcmask 1041408   ;;  %vm197_vm3 = vcmask 1042432   ;;  %vm199_vm4 = vcmask 1043456   ;;  %vm201_vm5 = vcmask 1044480  }
  0x17   :  { %s921_s24 = smov 24   ;;  %s922_s25 = smov 104   ;;  %774 = vset.pattern.permute.xlu0 %v928_v19  ;;  %vm203_vm6 = vcmask 1045504   ;;  %vm205_vm7 = vcmask 1046528   ;;  %v104_v45 = vld [vmem:[%s1245_s4] sm:$0xff]  ;;  %vm222_vm8 = vcmask 7168  }
  0x18   :  { %134 = vmatpush.msra.mxu0 %v99_v2  ;;  %s923_s27 = smov 96   ;;  %s924_s28 = smov 88   ;;  %vm225_vm9 = vcmask 72704   ;;  %v1132_v63 = vld [vmem:[%s1244_s3] sm:$0xff]  ;;  %vm247_vm10 = vcmask 392192   ;;  %vm271_vm11 = vcmask 64512  }
  0x19   :  { %s925_s29 = smov 16   ;;  %s926_s30 = smov 72   ;;  %vm299_vm12 = vcmask 15360   ;;  %vm301_vm13 = vcmask 146432   ;;  %vm315_vm14 = vcmask 195584   ;;  %vm339_vm15 = vcmask 130048  }
  0x1a   :  { %135 = vmatpush.msra.mxu0 %v98_v3  ;;  %s927_s1 = smov 80   ;;  %s929_s12 = smov 1  }
  0x1b   :  { %702 = vmatmul.msk.f32.vlgmr.msra.gmra.mxu0 %vm116_vm0, %v112_v4  ;;  %s930_s4 = smov 127   ;;  %s931_s15 = smov 126   ;;  %vm376_vm0 = vcmask 23552  }
  0x1c   :  { %s932_s3 = smov 2  }
  0x98   :  { %v137_v6 = vpop.f32.mrf.mxu0 }
  0x99   :  { %v1017_v7 = vadd.f32 %v775_v5, %v137_v6 }
  0x9b   :  { %169 = vrot.lane.b32.xlu0 %v1017_v7, %s914_s18  ;;  %v1022_v8 = vrot.slane %v1017_v7, 5  ;;  %v1025_v9 = vrot.slane %v1017_v7, 6  ;;  %v1032_v10 = vrot.slane %v1017_v7, 7  ;;  %v1041_v11 = vrot.slane %v1017_v7, 4 }
  0x9c   :  { %v1046_v12 = vrot.slane %v1017_v7, 3  ;;  %v1055_v13 = vrot.slane %v1017_v7, 2  ;;  %v1062_v14 = vrot.slane %v1017_v7, 1 }
  0x9d   :  { %178 = vrot.lane.b32.xlu2 %v1022_v8, %s915_s19  ;;  %175 = vrot.lane.b32.xlu1 %v1025_v9, %s916_s20 }
  0xa3   :  { %172 = vrot.lane.b32.xlu0 %v1032_v10, %s917_s2 }
  0xa5   :  { %146 = vrot.lane.b32.xlu2 %v1025_v9, %s918_s21  ;;  %142 = vrot.lane.b32.xlu1 %v1032_v10, %s919_s22 }
  0xab   :  { %181 = vrot.lane.b32.xlu0 %v1041_v11, %s920_s23 }
  0xad   :  { %184 = vrot.lane.b32.xlu2 %v1046_v12, %s921_s24  ;;  %150 = vrot.lane.b32.xlu1 %v1022_v8, %s922_s25 }
  0xb3   :  { %154 = vrot.lane.b32.xlu0 %v1041_v11, %s923_s27 }
  0xb5   :  { %158 = vrot.lane.b32.xlu2 %v1046_v12, %s924_s28  ;;  %187 = vrot.lane.b32.xlu1 %v1055_v13, %s925_s29 }
  0xbb   :  { %190 = vrot.lane.b32.xlu0 %v1062_v14, %s910_s26 }
  0xbd   :  { %166 = vrot.lane.b32.xlu2 %v1062_v14, %s926_s30  ;;  %162 = vrot.lane.b32.xlu1 %v1055_v13, %s927_s1 }
  0xf7   :  { %v179_v15 = vpop.permute.xlu2 %178 }
  0xff   :  { %v147_v18 = vpop.permute.xlu2 %146 }
 0x107   :  { %v185_v22 = vpop.permute.xlu2 %184 }
 0x10d   :  { %v170_v16 = vpop.permute.xlu0 %169 }
 0x10f   :  { %v176_v17 = vpop.permute.xlu1 %175  ;;  %v159_v28 = vpop.permute.xlu2 %158 }
 0x115   :  { %v173_v20 = vpop.permute.xlu0 %172 }
 0x116   :  { %v207_v25 = vsel %vm193_vm1, %v170_v16, %v173_v20 }
 0x117   :  { %v143_v21 = vpop.permute.xlu1 %142  ;;  %v208_v26 = vsel %vm195_vm2, %v207_v25, %v176_v17  ;;  %v167_v42 = vpop.permute.xlu2 %166 }
 0x118   :  { %v194_v29 = vsel %vm193_vm1, %v1017_v7, %v143_v21  ;;  %v209_v31 = vsel %vm197_vm3, %v208_v26, %v179_v15  ;;  %v105_v26 = vld [vmem:[#allocation7] sm:$0xff] }
 0x119   :  { %v196_v33 = vsel %vm195_vm2, %v194_v29, %v147_v18  ;;  %290 = vmatpush.msra.mxu2 %v105_v26 }
 0x11d   :  { %v182_v23 = vpop.permute.xlu0 %181 }
 0x11e   :  { %v210_v32 = vsel %vm199_vm4, %v209_v31, %v182_v23 }
 0x11f   :  { %v151_v24 = vpop.permute.xlu1 %150  ;;  %v211_v36 = vsel %vm201_vm5, %v210_v32, %v185_v22 }
 0x120   :  { %v198_v34 = vsel %vm197_vm3, %v196_v33, %v151_v24 }
 0x125   :  { %v155_v27 = vpop.permute.xlu0 %154 }
 0x126   :  { %v200_v35 = vsel %vm199_vm4, %v198_v34, %v155_v27 }
 0x127   :  { %v188_v30 = vpop.permute.xlu1 %187  ;;  %v202_v41 = vsel %vm201_vm5, %v200_v35, %v159_v28 }
 0x128   :  { %v212_v37 = vsel %vm203_vm6, %v211_v36, %v188_v30 }
 0x12d   :  { %v191_v38 = vpop.permute.xlu0 %190 }
 0x12e   :  { %v213_v39 = vsel %vm205_vm7, %v212_v37, %v191_v38 }
 0x12f   :  { %v163_v40 = vpop.permute.xlu1 %162  ;;  %218 = vrot.lane.b32.xlu0 %v213_v39, %s929_s12 }
 0x130   :  { %v204_v43 = vsel %vm203_vm6, %v202_v41, %v163_v40 }
 0x131   :  { %v206_v44 = vsel %vm205_vm7, %v204_v43, %v167_v42  ;;  %v107_v43 = vld [vmem:[%s1248_s7] sm:$0xf]  ;;  %s935_s7 = smov 122  }
 0x132   :  { %216 = vrot.lane.b32.xlu1 %v206_v44, %s929_s12 }
 0x13a   :  { %244 = vperm.xlu1 %763, %v104_v45  }
 0x142   :  { %463 = vrot.lane.b32.xlu1 %v1032_v10, %s916_s20  ;;  %s936_s20 = smov 123  }
 0x14a   :  { %439 = vrot.lane.b32.xlu1 %v1032_v10, %s918_s21 }
 0x152   :  { %472 = vrot.lane.b32.xlu1 %v1041_v11, %s921_s24 }
 0x15a   :  { %448 = vrot.lane.b32.xlu1 %v1041_v11, %s924_s28  ;;  %s687_s28 = sshll.u32 %s1252_s11, 4  ;;  %s688_s28 = int_to_ptr.hbm [resolvable:$true] %s687_s28 }
 0x162   :  { %454 = vrot.lane.b32.xlu1 %v1055_v13, %s926_s30 }
 0x1a1   :  { %v219_v46 = vpop.permute.xlu0 %218 }
 0x1a2   :  { %v224_v47 = vsel %vm222_vm8, 0.0, %v219_v46 }
 0x1a3   :  { %v227_v50 = vsel %vm225_vm9, %v224_v47, 0.0 }
 0x1a4   :  { %v217_v48 = vpop.permute.xlu1 %216 }
 0x1a5   :  { %v223_v49 = vsel %vm222_vm8, 0.0, %v217_v48 }
 0x1a6   :  { %v226_v51 = vsel %vm225_vm9, %v223_v49, 0.0 }
 0x1a7   :  { %v758_v52 = vpack.i.bf16 %v226_v51, %v227_v50  ;;  %v1179_v50 = vld [vmem:[#allocation8 + $0x8] sm:$0xff]  ;;  %v1182_v51 = vld [vmem:[#allocation8] sm:$0xff] }
 0x1a8   :  { %357 = vmatpush.msrb.mxu2 %v1179_v50 }
 0x1a9   :  { %759 = vrot.lane.b32.xlu0 %v758_v52, %s930_s4  ;;  %754 = vrot.lane.b32.xlu2 %v758_v52, %s931_s15 }
 0x1aa   :  { %358 = vmatpush.msrb.mxu2 %v1182_v51 }
 0x1ac   :  { %v1126_v56 = vpop.permute.xlu1 %244 }
 0x1b1   :  { %460 = vrot.lane.b32.xlu0 %v1017_v7, %s917_s2  ;;  %457 = vrot.lane.b32.xlu2 %v1062_v14, %s914_s18  ;;  %s937_s2 = smov 125  }
 0x1b4   :  { %v464_v59 = vpop.permute.xlu1 %463 }
 0x1b9   :  { %466 = vrot.lane.b32.xlu0 %v1025_v9, %s915_s19  ;;  %436 = vrot.lane.b32.xlu2 %v1017_v7, %s919_s22 }
 0x1bc   :  { %v440_v1 = vpop.permute.xlu1 %439 }
 0x1c1   :  { %442 = vrot.lane.b32.xlu0 %v1025_v9, %s922_s25  ;;  %469 = vrot.lane.b32.xlu2 %v1022_v8, %s920_s23 }
 0x1c4   :  { %v473_v4 = vpop.permute.xlu1 %472 }
 0x1c9   :  { %475 = vrot.lane.b32.xlu0 %v1046_v12, %s925_s29  ;;  %445 = vrot.lane.b32.xlu2 %v1022_v8, %s923_s27  ;;  %s939_s29 = smov 4  }
 0x1d1   :  { %451 = vrot.lane.b32.xlu0 %v1046_v12, %s927_s1  ;;  %478 = vrot.lane.b32.xlu2 %v1055_v13, %s910_s26  ;;  %v449_v12 = vpop.permute.xlu1 %448  ;;  %s933_s26 = smov 124  }
 0x1d9   :  { %v455_v23 = vpop.permute.xlu1 %454 }
 0x203   :  { %v755_v53 = vpop.permute.xlu2 %754 }
 0x204   :  { %v756_v54 = vunpack.i.l.bf16 %v755_v53  ;;  %v757_v55 = vunpack.i.h.bf16 %v755_v53 }
 0x206   :  { %261 = vmatpush.msra.mxu1 %v756_v54 }
 0x208   :  { %262 = vmatpush.msra.mxu1 %v757_v55 }
 0x20b   :  { %v458_v57 = vpop.permute.xlu2 %457 }
 0x213   :  { %v437_v61 = vpop.permute.xlu2 %436 }
 0x214   :  { %v481_v11 = vsel %vm193_vm1, %v1062_v14, %v437_v61 }
 0x215   :  { %v482_v17 = vsel %vm195_vm2, %v481_v11, %v440_v1 }
 0x21b   :  { %v760_v58 = vpop.permute.xlu0 %759  ;;  %v470_v2 = vpop.permute.xlu2 %469 }
 0x21c   :  { %v761_v60 = vunpack.i.l.bf16 %v760_v58  ;;  %v762_v62 = vunpack.i.h.bf16 %v760_v58 }
 0x21e   :  { %263 = vmatpush.msra.mxu1 %v761_v60 }
 0x220   :  { %264 = vmatpush.msra.mxu1 %v762_v62 }
 0x222   :  { %703 = vmatpush.msk.msra.mxu1 %vm225_vm9, %v224_v47 }
 0x223   :  { %v461_v0 = vpop.permute.xlu0 %460  ;;  %v446_v6 = vpop.permute.xlu2 %445 }
 0x224   :  { %704 = vmatpush.msk.msra.mxu1 %vm225_vm9, %v223_v49  ;;  %v488_v5 = vsel %vm193_vm1, %v458_v57, %v461_v0  ;;  %v106_v49 = vld [vmem:[%s1247_s6] sm:$0xf]  ;;  %s934_s6 = smov 3   ;;  %vm378_vm1 = vcmask 285696  }
 0x225   :  { %705 = vmatmul.msk.f32.vlgmr.msra.gmra.mxu1 %vm247_vm10, %v1132_v63  ;;  %v489_v8 = vsel %vm195_vm2, %v488_v5, %v464_v59  ;;  %vm407_vm2 = vcmask 228352  }
 0x22b   :  { %v467_v3 = vpop.permute.xlu0 %466  ;;  %v479_v16 = vpop.permute.xlu2 %478 }
 0x22c   :  { %v490_v9 = vsel %vm197_vm3, %v489_v8, %v467_v3 }
 0x22d   :  { %v491_v10 = vsel %vm199_vm4, %v490_v9, %v470_v2 }
 0x22e   :  { %v492_v15 = vsel %vm201_vm5, %v491_v10, %v473_v4 }
 0x233   :  { %v443_v7 = vpop.permute.xlu0 %442 }
 0x234   :  { %v483_v19 = vsel %vm197_vm3, %v482_v17, %v443_v7  ;;  %vm433_vm3 = vcmask 257024  }
 0x235   :  { %v484_v21 = vsel %vm199_vm4, %v483_v19, %v446_v6 }
 0x236   :  { %v485_v14 = vsel %vm201_vm5, %v484_v21, %v449_v12 }
 0x23b   :  { %v476_v13 = vpop.permute.xlu0 %475 }
 0x23c   :  { %v493_v18 = vsel %vm203_vm6, %v492_v15, %v476_v13 }
 0x23d   :  { %v494_v20 = vsel %vm205_vm7, %v493_v18, %v479_v16 }
 0x23e   :  { %499 = vrot.lane.b32.xlu0 %v494_v20, %s929_s12 }
 0x243   :  { %v452_v22 = vpop.permute.xlu0 %451 }
 0x244   :  { %v486_v24 = vsel %vm203_vm6, %v485_v14, %v452_v22  ;;  %v110_v22 = vld [vmem:[%s1250_s9] sm:$0xf] }
 0x245   :  { %v487_v25 = vsel %vm205_vm7, %v486_v24, %v455_v23 }
 0x246   :  { %497 = vrot.lane.b32.xlu1 %v487_v25, %s929_s12 }
 0x2a2   :  { %v268_v27 = vpop.f32.mrf.mxu1 }
 0x2a3   :  { %v269_v28 = vadd.f32 %v268_v27, %v1126_v56 }
 0x2a5   :  { %706 = vmatmul.msk.f32.vlgmr.msra.gmra.mxu2 %vm271_vm11, %v269_v28 }
 0x2a6   :  { %559 = vmatpush.msra.mxu2 %v105_v26 }
 0x2b0   :  { %v500_v29 = vpop.permute.xlu0 %499 }
 0x2b1   :  { %v504_v30 = vsel %vm222_vm8, 0.0, %v500_v29 }
 0x2b2   :  { %v506_v33 = vsel %vm225_vm9, %v504_v30, 0.0 }
 0x2b8   :  { %v498_v31 = vpop.permute.xlu1 %497 }
 0x2b9   :  { %v503_v32 = vsel %vm222_vm8, 0.0, %v498_v31 }
 0x2ba   :  { %v505_v34 = vsel %vm225_vm9, %v503_v32, 0.0 }
 0x2bb   :  { %v769_v35 = vpack.i.bf16 %v505_v34, %v506_v33 }
 0x2bd   :  { %765 = vrot.lane.b32.xlu1 %v769_v35, %s931_s15 }
 0x328   :  { %v292_v36 = vpop.f32.mrf.mxu2 }
 0x329   :  { %296 = vrot.lane.b32.xlu2 %v292_v36, %s932_s3 }
 0x32f   :  { %v766_v37 = vpop.permute.xlu1 %765 }
 0x330   :  { %v767_v38 = vunpack.i.l.bf16 %v766_v37  ;;  %v768_v39 = vunpack.i.h.bf16 %v766_v37 }
 0x332   :  { %531 = vmatpush.msrb.mxu0 %v767_v38 }
 0x334   :  { %532 = vmatpush.msrb.mxu0 %v768_v39 }
 0x383   :  { %v297_v40 = vpop.permute.xlu2 %296 }
 0x384   :  { %v300_v41 = vsel %vm299_vm12, 0.0, %v297_v40  ;;  %v111_v40 = vld [vmem:[%s1251_s10] sm:$0xf]  ;;  %s938_s10 = smov [#allocation10]  }
 0x385   :  { %v302_v42 = vsel %vm301_vm13, %v300_v41, 0.0  ;;  %s685_s24 = sshll.u32 %s938_s10, 4  ;;  %s686_s24 = int_to_ptr.vmem [resolvable:$true] %s685_s24 }
 0x386   :  { %304 = vrot.lane.b32.xlu0 %v302_v42, %s931_s15  ;;  %307 = vrot.lane.b32.xlu2 %v302_v42, %s933_s26 }
 0x38e   :  { %770 = vrot.lane.b32.xlu2 %v769_v35, %s930_s4  ;;  %312 = vperm.xlu0 %774, %v107_v43  }
 0x3e0   :  { %v308_v44 = vpop.permute.xlu2 %307 }
 0x3e1   :  { %332 = vmatpush.msra.mxu3 %v308_v44 }
 0x3e8   :  { %v771_v45 = vpop.permute.xlu2 %770 }
 0x3e9   :  { %v772_v46 = vunpack.i.l.bf16 %v771_v45  ;;  %v773_v47 = vunpack.i.h.bf16 %v771_v45 }
 0x3eb   :  { %533 = vmatpush.msrb.mxu0 %v772_v46 }
 0x3ed   :  { %534 = vmatpush.msrb.mxu0 %v773_v47 }
 0x3ef   :  { %712 = vmatpush.msk.msrb.mxu0 %vm225_vm9, %v504_v30 }
 0x3f1   :  { %713 = vmatpush.msk.msrb.mxu0 %vm225_vm9, %v503_v32 }
 0x3f2   :  { %714 = vmatmul.msk.f32.vlgmr.msrb.gmra.mxu0 %vm247_vm10, %v1132_v63 }
 0x3f8   :  { %v305_v48 = vpop.permute.xlu0 %304 }
 0x3f9   :  { %333 = vmatpush.msra.mxu3 %v305_v48 }
 0x3fb   :  { %707 = vmatpush.msk.msra.mxu3 %vm301_vm13, %v300_v41 }
 0x3fc   :  { %708 = vmatmul.msk.f32.vlgmr.msra.gmra.mxu3 %vm315_vm14, %v106_v49 }
 0x400   :  { %v1185_v52 = vpop.permute.xlu0 %312 }
 0x46f   :  { %v538_v55 = vpop.f32.mrf.mxu0 }
 0x470   :  { %v539_v57 = vadd.f32 %v538_v55, %v1126_v56 }
 0x47f   :  { %v336_v53 = vpop.f32.mrf.mxu3 }
 0x480   :  { %v337_v54 = vadd.f32 %v336_v53, %v1185_v52 }
 0x482   :  { %709 = vmatmul.msk.f32.vlgmr.msrb.gmra.mxu2 %vm339_vm15, %v337_v54 }
 0x48a   :  { %715 = vmatmul.msk.f32.vlgmr.msra.gmra.mxu2 %vm271_vm11, %v539_v57 }
 0x505   :  { %v360_v58 = vpop.f32.mrf.mxu2 }
 0x506   :  { %v364_v60 = vmul.f32 0.044715, %v360_v58  ;;  %v363_v5 = vmul.f32 0.5, %v360_v58 }
 0x508   :  { %v365_v61 = vmul.f32 %v364_v60, %v360_v58 }
 0x50a   :  { %v366_v62 = vmul.f32 %v365_v61, %v360_v58 }
 0x50c   :  { %v367_v63 = vadd.f32 %v366_v62, %v360_v58 }
 0x50d   :  { %v561_v59 = vpop.f32.mrf.mxu2 }
 0x50e   :  { %565 = vrot.lane.b32.xlu1 %v561_v59, %s932_s3  ;;  %v368_v0 = vmul.f32 0.7978846, %v367_v63 }
 0x510   :  { %776 = vtanh.f32 %v368_v0 }
 0x516   :  { %v777_v3 = vpop.eup %776 }
 0x517   :  { %v370_v56 = vadd.f32 1.0, %v777_v3 }
 0x519   :  { %v371_v6 = vmul.f32 %v370_v56, %v363_v5 }
 0x580   :  { %v566_v1 = vpop.permute.xlu1 %565 }
 0x581   :  { %v568_v2 = vsel %vm299_vm12, 0.0, %v566_v1 }
 0x582   :  { %v569_v4 = vsel %vm301_vm13, %v568_v2, 0.0 }
 0x583   :  { %571 = vrot.lane.b32.xlu1 %v569_v4, %s931_s15  ;;  %574 = vrot.lane.b32.xlu2 %v569_v4, %s933_s26 }
 0x58b   :  { %373 = vrot.lane.b32.xlu2 %v371_v6, %s934_s6 }
 0x5dd   :  { %v575_v7 = vpop.permute.xlu2 %574 }
 0x5de   :  { %590 = vmatpush.msrb.mxu1 %v575_v7 }
 0x5e5   :  { %v374_v8 = vpop.permute.xlu2 %373 }
 0x5e6   :  { %v377_v9 = vsel %vm376_vm0, 0.0, %v374_v8 }
 0x5e7   :  { %v379_v10 = vsel %vm378_vm1, %v377_v9, 0.0 }
 0x5e8   :  { %391 = vrot.lane.b32.xlu1 %v379_v10, %s933_s26  ;;  %397 = vrot.lane.b32.xlu0 %v379_v10, %s935_s7  ;;  %v381_v11 = vrot.slane %v379_v10, 4 }
 0x5ea   :  { %394 = vrot.lane.b32.xlu2 %v381_v11, %s936_s20 }
 0x5f0   :  { %385 = vrot.lane.b32.xlu0 %v379_v10, %s931_s15  ;;  %388 = vrot.lane.b32.xlu1 %v381_v11, %s937_s2 }
 0x5f2   :  { %382 = vrot.lane.b32.xlu2 %v381_v11, %s930_s4 }
 0x5f5   :  { %v572_v12 = vpop.permute.xlu1 %571 }
 0x5f6   :  { %591 = vmatpush.msrb.mxu1 %v572_v12 }
 0x5f8   :  { %716 = vmatpush.msk.msrb.mxu1 %vm301_vm13, %v568_v2 }
 0x5f9   :  { %717 = vmatmul.msk.f32.vlgmr.msrb.gmra.mxu1 %vm315_vm14, %v106_v49 }
 0x644   :  { %v395_v13 = vpop.permute.xlu2 %394 }
 0x64c   :  { %v383_v18 = vpop.permute.xlu2 %382 }
 0x64d   :  { %v399_v14 = vsel %vm199_vm4, %v379_v10, %v383_v18 }
 0x65a   :  { %v392_v15 = vpop.permute.xlu1 %391  ;;  %v398_v16 = vpop.permute.xlu0 %397 }
 0x65b   :  { %710 = vmatpush.msk.msrb.mxu3 %vm199_vm4, %v398_v16  ;;  %v401_v17 = vsel %vm199_vm4, %v392_v15, %v395_v13 }
 0x65d   :  { %426 = vmatpush.msrb.mxu3 %v401_v17 }
 0x662   :  { %v386_v19 = vpop.permute.xlu0 %385  ;;  %v389_v20 = vpop.permute.xlu1 %388 }
 0x663   :  { %v400_v21 = vsel %vm199_vm4, %v386_v19, %v389_v20 }
 0x664   :  { %427 = vmatpush.msrb.mxu3 %v400_v21 }
 0x666   :  { %428 = vmatpush.msrb.mxu3 %v399_v14 }
 0x667   :  { %711 = vmatmul.msk.f32.vlgmr.msrb.gmra.mxu3 %vm407_vm2, %v110_v22 }
 0x668   :  { %614 = vmatpush.msra.mxu3 %v1179_v50 }
 0x66a   :  { %615 = vmatpush.msra.mxu3 %v1182_v51 }
 0x676   :  { %v594_v23 = vpop.f32.mrf.mxu1 }
 0x677   :  { %v595_v24 = vadd.f32 %v594_v23, %v1185_v52 }
 0x679   :  { %718 = vmatmul.msk.f32.vlgmr.msra.gmra.mxu3 %vm339_vm15, %v595_v24 }
 0x6ea   :  { %v430_v25 = vpop.f32.mrf.mxu3 }
 0x6fc   :  { %v617_v26 = vpop.f32.mrf.mxu3 }
 0x6fd   :  { %v621_v27 = vmul.f32 0.044715, %v617_v26  ;;  %v620_v33 = vmul.f32 0.5, %v617_v26 }
 0x6ff   :  { %v622_v28 = vmul.f32 %v621_v27, %v617_v26 }
 0x701   :  { %v623_v29 = vmul.f32 %v622_v28, %v617_v26 }
 0x703   :  { %v624_v30 = vadd.f32 %v623_v29, %v617_v26 }
 0x705   :  { %v625_v31 = vmul.f32 0.7978846, %v624_v30 }
 0x707   :  { %778 = vtanh.f32 %v625_v31 }
 0x70d   :  { %v779_v32 = vpop.eup %778 }
 0x70e   :  { %v627_v34 = vadd.f32 1.0, %v779_v32 }
 0x710   :  { %v628_v35 = vmul.f32 %v627_v34, %v620_v33 }
 0x712   :  { %630 = vrot.lane.b32.xlu0 %v628_v35, %s934_s6 }
 0x784   :  { %v631_v36 = vpop.permute.xlu0 %630 }
 0x785   :  { %v633_v37 = vsel %vm376_vm0, 0.0, %v631_v36 }
 0x786   :  { %v634_v38 = vsel %vm378_vm1, %v633_v37, 0.0 }
 0x787   :  { %646 = vrot.lane.b32.xlu2 %v634_v38, %s933_s26  ;;  %652 = vrot.lane.b32.xlu1 %v634_v38, %s935_s7  ;;  %v636_v39 = vrot.slane %v634_v38, 4 }
 0x789   :  { %649 = vrot.lane.b32.xlu0 %v636_v39, %s936_s20 }
 0x78f   :  { %640 = vrot.lane.b32.xlu1 %v634_v38, %s931_s15  ;;  %643 = vrot.lane.b32.xlu2 %v636_v39, %s937_s2 }
 0x791   :  { %637 = vrot.lane.b32.xlu0 %v636_v39, %s930_s4 }
 0x797   :  { %404 = vperm.xlu1 %763, %v111_v40  }
 0x7e1   :  { %v647_v41 = vpop.permute.xlu2 %646 }
 0x7e9   :  { %v644_v45 = vpop.permute.xlu2 %643 }
 0x7f9   :  { %v653_v42 = vpop.permute.xlu1 %652 }
 0x7fa   :  { %719 = vmatpush.msk.msrb.mxu2 %vm199_vm4, %v653_v42 }
 0x7fb   :  { %v650_v43 = vpop.permute.xlu0 %649 }
 0x7fc   :  { %v656_v44 = vsel %vm199_vm4, %v647_v41, %v650_v43 }
 0x7fd   :  { %672 = vmatpush.msrb.mxu2 %v656_v44 }
 0x801   :  { %v641_v46 = vpop.permute.xlu1 %640 }
 0x802   :  { %v655_v47 = vsel %vm199_vm4, %v641_v46, %v644_v45 }
 0x803   :  { %673 = vmatpush.msrb.mxu2 %v655_v47  ;;  %v638_v48 = vpop.permute.xlu0 %637 }
 0x804   :  { %v654_v49 = vsel %vm199_vm4, %v634_v38, %v638_v48 }
 0x805   :  { %674 = vmatpush.msrb.mxu2 %v654_v49 }
 0x806   :  { %720 = vmatmul.msk.f32.vlgmr.msrb.gmra.mxu2 %vm407_vm2, %v110_v22 }
 0x809   :  { %v405_v50 = vpop.permute.xlu1 %404 }
 0x80a   :  { %v431_v51 = vadd.f32 %v430_v25, %v405_v50 }
 0x80c   :  { %434 = vst.msk [vmem:[#allocation10] sm:$0xf] %vm433_vm3, %v431_v51 }
 0x889   :  { %v676_v52 = vpop.f32.mrf.mxu2 }
 0x88a   :  { %v677_v53 = vadd.f32 %v676_v52, %v405_v50 }
 0x88c   :  { %680 = vst.msk [vmem:[#allocation10 + $0x4] sm:$0xf] %vm433_vm3, %v677_v53 }
 0x88d   :  { %693 = dma.vmem_to_hbm [thread:$0]  %s686_s24, 128, %s688_s28, [#allocation4], %s914_s18, %s914_s18, %s939_s29  }
 0x88e   :  { %906 = dma.done.wait [#allocation4], 128  }
 0x88f   :  { %907 = vsyncadd [#allocation4], 4294967168 }
 0x890   :  { %698 = vsyncpa [#allocation3], 1 }
 0x891   :  { %699 = vsyncpa [#allocation6], 1 }
 0x892   :  { %700 = vsyncpa [#allocation9], 1 }
 0x893   :  { %701 = vsyncpa [#allocation4], 1 }

</bundles_post_ra>
